<compile_context>
chip_gen: v5e
topology: v5e:2x2
jax: 0.10.0
libtpu: 0.0.40
codegen_flags: <defaults>
</compile_context>

<pallas_src>
from functools import partial

import jax
import jax.numpy as jnp
import numpy as np
from jax.experimental import pallas as pl
from jax.experimental.pallas import tpu as pltpu


# ------------------------------ Fused kernel --------------------------------

def _roberta_output_kernel(x_ref, w_ref, bgb_ref, res_ref, o_ref, *, eps):
    """Blocks:
        x_ref   : (tm, I)  activation tile (bf16), full reduction dim
        w_ref   : (I,  H)  pre-transposed dense weight, VMEM-resident (bf16)
        bgb_ref : (3,  H)  packed [dense bias; LN gamma; LN beta] (f32)
        res_ref : (tm, H)  residual (input_tensor) tile
        o_ref   : (tm, H)  output tile
    """
    # One MXU matmul over the full K; f32 accumulation.
    y = jnp.dot(x_ref[...], w_ref[...], preferred_element_type=jnp.float32)
    # dense bias + residual add (dropout is identity in eval mode)
    y = y + bgb_ref[0:1, :] + res_ref[...].astype(jnp.float32)
    # LayerNorm over the hidden dimension (biased variance, matches torch)
    mean = jnp.mean(y, axis=-1, keepdims=True)
    centered = y - mean
    var = jnp.mean(centered * centered, axis=-1, keepdims=True)
    inv = jax.lax.rsqrt(var + eps)
    out = centered * inv * bgb_ref[1:2, :] + bgb_ref[2:3, :]
    o_ref[...] = out.astype(o_ref.dtype)


def _round_up(x, m):
    return ((x + m - 1) // m) * m


def _resident_spec(block_shape, index_map):
    """BlockSpec for an operand whose block never changes: single-buffered."""
    try:
        return pl.BlockSpec(block_shape, index_map, pipeline_mode=pl.Buffered(1))
    except (AttributeError, TypeError):
        # Older JAX without pipeline_mode / Buffered: fall back to default.
        return pl.BlockSpec(block_shape, index_map)


# ------------------------------ Module wrapper -------------------------------

def prepare_params(params, compute_dtype=jnp.bfloat16):
    """One-time parameter prep: transpose W to (I, H) MXU layout, cast to the
    compute dtype, and pack [bias; gamma; beta] into a single (3, H) f32 slab."""
    return {
        "w_t": jnp.asarray(params["dense_w"].T, dtype=compute_dtype),  # (I, H)
        "bgb": jnp.stack(
            [params["dense_b"], params["ln_w"], params["ln_b"]]
        ).astype(jnp.float32),                                         # (3, H)
    }


def roberta_output(kernel_params, hidden_states, input_tensor, *, eps=1e-5):
    """hidden_states: (B, S, I); input_tensor: (B, S, H) -> (B, S, H).

    NOTE: eps must come from the model config (RobertaConfig.layer_norm_eps);
    some checkpoints use 1e-12 rather than the 1e-5 default here.
    """
    B, S, I = hidden_states.shape
    H = input_tensor.shape[-1]
    M = B * S

    w_t = kernel_params["w_t"]          # (I, H), compute dtype (bf16)
    bgb = kernel_params["bgb"]          # (3, H), f32
    compute_dtype = w_t.dtype
    out_dtype = hidden_states.dtype

    x2d = hidden_states.reshape(M, I).astype(compute_dtype)
    res2d = input_tensor.reshape(M, H)

    # --- M-tile selection: pad M up instead of shrinking tm ------------------
    # tm=512 fits v7x's 64 MiB VMEM with the resident weight and keeps >=2
    # parallel blocks (both TensorCores busy) for any real batch*seq size.
    if M >= 1024:
        tm = 512
    elif M >= 256:
        tm = 128
    else:
        tm = _round_up(max(M, 16), 16)   # bf16 needs sublane multiples of 16
    M_pad = _round_up(M, tm)
    if M_pad != M:
        x2d = jnp.pad(x2d, ((0, M_pad - M), (0, 0)))
        res2d = jnp.pad(res2d, ((0, M_pad - M), (0, 0)))

    grid = (M_pad // tm,)

    cost = pl.CostEstimate(
        flops=2 * M_pad * I * H,
        transcendentals=M_pad,  # one rsqrt per row
        bytes_accessed=int(
            x2d.size * x2d.dtype.itemsize
            + w_t.size * w_t.dtype.itemsize
            + res2d.size * res2d.dtype.itemsize
            + bgb.size * bgb.dtype.itemsize
            + M_pad * H * jnp.dtype(out_dtype).itemsize
        ),
    )

    out2d = pl.pallas_call(
        partial(_roberta_output_kernel, eps=eps),
        out_shape=jax.ShapeDtypeStruct((M_pad, H), out_dtype),
        grid_spec=pltpu.PrefetchScalarGridSpec(
            num_scalar_prefetch=0,
            grid=grid,
            in_specs=[
                pl.BlockSpec((tm, I), lambda i: (i, 0)),   # x tile, full K
                _resident_spec((I, H), lambda i: (0, 0)),  # W^T, VMEM-resident
                _resident_spec((3, H), lambda i: (0, 0)),  # [bias; gamma; beta]
                pl.BlockSpec((tm, H), lambda i: (i, 0)),   # residual tile
            ],
            out_specs=pl.BlockSpec((tm, H), lambda i: (i, 0)),
        ),
        compiler_params=pltpu.CompilerParams(
            dimension_semantics=("parallel",),
            vmem_limit_bytes=48 * 1024 * 1024,
        ),
        cost_estimate=cost,
    )(x2d, w_t, bgb, res2d)

    return out2d[:M].reshape(B, S, H)


# ------------------------------- Parameters ----------------------------------

def make_params(key, intermediate_size, hidden_size):
    ks = jax.random.split(key, 4)
    return {
        "dense_w": jax.random.normal(ks[0], (hidden_size, intermediate_size),
                                     jnp.float32) * 0.02,
        "dense_b": jax.random.normal(ks[1], (hidden_size,), jnp.float32) * 0.02,
        "ln_w": 1.0 + jax.random.normal(ks[2], (hidden_size,), jnp.float32) * 0.1,
        "ln_b": jax.random.normal(ks[3], (hidden_size,), jnp.float32) * 0.1,
    }


# -------------------------------- Reference ----------------------------------

def reference(params, hidden_states, input_tensor, eps=1e-5):
    y = jnp.einsum("bsi,hi->bsh", hidden_states, params["dense_w"]) \
        + params["dense_b"]
    y = y + input_tensor
    mean = jnp.mean(y, axis=-1, keepdims=True)
    var = jnp.mean((y - mean) ** 2, axis=-1, keepdims=True)
    return (y - mean) / jnp.sqrt(var + eps) * params["ln_w"] + params["ln_b"]


# ---------------------------------- Main --------------------------------------

if __name__ == "__main__":
    B, S, H, I = 2, 8, 32, 128  # hidden=32, intermediate=4*hidden=128

    key = jax.random.PRNGKey(0)
    k_params, k_x, k_res = jax.random.split(key, 3)
    params = make_params(k_params, I, H)
    kernel_params = prepare_params(params)   # bf16 W^T + packed (3, H) f32

    hidden_states = jax.random.normal(k_x, (B, S, I), jnp.float32)
    input_tensor = jax.random.normal(k_res, (B, S, H), jnp.float32)

    out = roberta_output(kernel_params, hidden_states, input_tensor, eps=1e-5)
    out = jax.block_until_ready(out)

    ref = reference(params, hidden_states, input_tensor, eps=1e-5)
    assert out.shape == (B, S, H)
    # Tolerance reflects the deliberate bf16 rounding of x and W feeding the MXU
    # (accumulation and LayerNorm remain f32).
    err = float(np.max(np.abs(np.asarray(out, np.float32) - np.asarray(ref))))
    assert err < 2e-2, f"max abs err vs f32 reference: {err}"

    print("KERNEL_OK")
</pallas_src>

<mosaic_0001>
module attributes {stable_mosaic.version = 11 : i64} {
  func.func @_roberta_output_kernel(%arg0: i32, %arg1: memref<16x128xbf16, #tpu.memory_space<vmem>>, %arg2: memref<128x32xbf16, #tpu.memory_space<vmem>>, %arg3: memref<3x32xf32, #tpu.memory_space<vmem>>, %arg4: memref<16x32xf32, #tpu.memory_space<vmem>>, %arg5: memref<16x32xf32, #tpu.memory_space<vmem>>) attributes {dimension_semantics = [#tpu.dimension_semantics<parallel>], iteration_bounds = array<i64: 1>, scalar_prefetch = 0 : i64, scratch_operands = 0 : i64, tpu.core_type = #tpu.core_type<tc>, window_params = [{transform_indices = @transform_0, window_bounds = array<i64: 16, 128>}, {pipeline_mode = #tpu.pipeline_mode<synchronous>, transform_indices = @transform_1, window_bounds = array<i64: 128, 32>}, {pipeline_mode = #tpu.pipeline_mode<synchronous>, transform_indices = @transform_2, window_bounds = array<i64: 3, 32>}, {transform_indices = @transform_3, window_bounds = array<i64: 16, 32>}, {transform_indices = @transform_4, window_bounds = array<i64: 16, 32>}]} {
    %c0 = arith.constant 0 : index
    %c0_0 = arith.constant 0 : index
    %0 = vector.load %arg1[%c0, %c0_0] : memref<16x128xbf16, #tpu.memory_space<vmem>>, vector<16x128xbf16>
    %c0_1 = arith.constant 0 : index
    %c0_2 = arith.constant 0 : index
    %1 = vector.load %arg2[%c0_1, %c0_2] : memref<128x32xbf16, #tpu.memory_space<vmem>>, vector<128x32xbf16>
    %cst = arith.constant dense<0.000000e+00> : vector<16x32xf32>
    %2 = tpu.matmul %0, %1, %cst {dimension_numbers = #tpu.dot_dimension_numbers<[1], [0], [0], [1], [0, 0, 1, 1], [], []>} : vector<16x128xbf16>, vector<128x32xbf16>, vector<16x32xf32> -> vector<16x32xf32>
    %c0_3 = arith.constant 0 : index
    %c0_4 = arith.constant 0 : index
    %3 = vector.load %arg3[%c0_3, %c0_4] : memref<3x32xf32, #tpu.memory_space<vmem>>, vector<1x32xf32>
    %4 = vector.broadcast %3 : vector<1x32xf32> to vector<16x32xf32>
    %5 = arith.addf %2, %4 : vector<16x32xf32>
    %c0_5 = arith.constant 0 : index
    %c0_6 = arith.constant 0 : index
    %6 = vector.load %arg4[%c0_5, %c0_6] : memref<16x32xf32, #tpu.memory_space<vmem>>, vector<16x32xf32>
    %7 = arith.addf %5, %6 : vector<16x32xf32>
    %cst_7 = arith.constant dense<0.000000e+00> : vector<16xf32>
    %8 = vector.multi_reduction <add>, %7, %cst_7 [1] : vector<16x32xf32> to vector<16xf32>
    %9 = vector.shape_cast %8 : vector<16xf32> to vector<16x1xf32>
    %cst_8 = arith.constant 3.200000e+01 : f32
    %10 = vector.broadcast %cst_8 : f32 to vector<16x1xf32>
    %11 = arith.divf %9, %10 : vector<16x1xf32>
    %12 = vector.broadcast %11 : vector<16x1xf32> to vector<16x32xf32>
    %13 = arith.subf %7, %12 : vector<16x32xf32>
    %14 = arith.mulf %13, %13 : vector<16x32xf32>
    %cst_9 = arith.constant dense<0.000000e+00> : vector<16xf32>
    %15 = vector.multi_reduction <add>, %14, %cst_9 [1] : vector<16x32xf32> to vector<16xf32>
    %16 = vector.shape_cast %15 : vector<16xf32> to vector<16x1xf32>
    %cst_10 = arith.constant 3.200000e+01 : f32
    %17 = vector.broadcast %cst_10 : f32 to vector<16x1xf32>
    %18 = arith.divf %16, %17 : vector<16x1xf32>
    %cst_11 = arith.constant 9.99999974E-6 : f32
    %19 = vector.broadcast %cst_11 : f32 to vector<16x1xf32>
    %20 = arith.addf %18, %19 : vector<16x1xf32>
    %21 = math.rsqrt %20 : vector<16x1xf32>
    %22 = vector.broadcast %21 : vector<16x1xf32> to vector<16x32xf32>
    %23 = arith.mulf %13, %22 : vector<16x32xf32>
    %c1 = arith.constant 1 : index
    %c0_12 = arith.constant 0 : index
    %24 = vector.load %arg3[%c1, %c0_12] : memref<3x32xf32, #tpu.memory_space<vmem>>, vector<1x32xf32>
    %25 = vector.broadcast %24 : vector<1x32xf32> to vector<16x32xf32>
    %26 = arith.mulf %23, %25 : vector<16x32xf32>
    %c2 = arith.constant 2 : index
    %c0_13 = arith.constant 0 : index
    %27 = vector.load %arg3[%c2, %c0_13] : memref<3x32xf32, #tpu.memory_space<vmem>>, vector<1x32xf32>
    %28 = vector.broadcast %27 : vector<1x32xf32> to vector<16x32xf32>
    %29 = arith.addf %26, %28 : vector<16x32xf32>
    %c0_14 = arith.constant 0 : index
    %c0_15 = arith.constant 0 : index
    %30 = vector.load %arg5[%c0_14, %c0_15] : memref<16x32xf32, #tpu.memory_space<vmem>>, vector<16x32xf32>
    tpu.vector_store %arg5[%c0_14, %c0_15], %29 {strides = array<i32>} : memref<16x32xf32, #tpu.memory_space<vmem>>, vector<16x32xf32>,
    return
  }
  func.func @transform_0(%arg0: i32) -> (i32, i32) {
    %c0_i32 = arith.constant 0 : i32
    %c0_i32_0 = arith.constant 0 : i32
    return %arg0, %c0_i32 : i32, i32
  }
  func.func @transform_1(%arg0: i32) -> (i32, i32) {
    %c0_i32 = arith.constant 0 : i32
    %c0_i32_0 = arith.constant 0 : i32
    %c0_i32_1 = arith.constant 0 : i32
    return %c0_i32, %c0_i32_0 : i32, i32
  }
  func.func @transform_2(%arg0: i32) -> (i32, i32) {
    %c0_i32 = arith.constant 0 : i32
    %c0_i32_0 = arith.constant 0 : i32
    %c0_i32_1 = arith.constant 0 : i32
    return %c0_i32, %c0_i32_0 : i32, i32
  }
  func.func @transform_3(%arg0: i32) -> (i32, i32) {
    %c0_i32 = arith.constant 0 : i32
    %c0_i32_0 = arith.constant 0 : i32
    return %arg0, %c0_i32 : i32, i32
  }
  func.func @transform_4(%arg0: i32) -> (i32, i32) {
    %c0_i32 = arith.constant 0 : i32
    %c0_i32_0 = arith.constant 0 : i32
    return %arg0, %c0_i32 : i32, i32
  }
}

</mosaic_0001>

<bundles_post_ra>
// kernel: tpu_custom_call.1
= control target key start
LH: loop header
LB: loop body
LE: loop exit
PB: predicated region body
PF: predicated region fallthrough
CT: control target
= control target key end

     0   :  { %s354_s0 = inlined_call_operand.vmem [shape: bf16[16,128], index: 0, kind: input, shape index: {}]   ;;  %s355_s1 = inlined_call_operand.vmem [shape: bf16[128,32], index: 1, kind: input, shape index: {}]   ;;  %s356_s2 = inlined_call_operand.vmem [shape: f32[3,32], index: 2, kind: input, shape index: {}]   ;;  %s357_s3 = inlined_call_operand.vmem [shape: f32[16,32], index: 3, kind: input, shape index: {}]   ;;  %s358_s4 = inlined_call_operand.hbm [shape: f32[16,32], index: 4, kind: output, shape index: {}]  }
   0x1   :  { %v234_v0 = vld [vmem:[%s355_s1 + $0x38] sm:$0xff]  ;;  %v233_v1 = vld [vmem:[%s355_s1 + $0x30] sm:$0xff] }
   0x2   :  { %92 = vmatpush.bf16.msra.mxu0 %v234_v0 }
   0x3   :  { %9 = vsyncpa [#allocation3], 0  ;;  %v232_v2 = vld [vmem:[%s355_s1 + $0x28] sm:$0xff]  ;;  %v231_v3 = vld [vmem:[%s355_s1 + $0x20] sm:$0xff]  ;;  %vm110_vm0 = vcmask 261120   ;;  %v274_v20 = vmov 32.0  }
   0x4   :  { %v230_v4 = vld [vmem:[%s355_s1 + $0x18] sm:$0xff]  ;;  %v229_v5 = vld [vmem:[%s355_s1 + $0x10] sm:$0xff]  ;;  %v228_v6 = vld [vmem:[%s355_s1 + $0x8] sm:$0xff]  ;;  %242 = vrcp.f32 %v274_v20  ;;  %s275_s14 = smov [#allocation2]   ;;  %s178_s18 = sshll.u32 %s358_s4, 4  ;;  %s179_s18 = int_to_ptr.hbm [resolvable:$true] %s178_s18 }
   0x5   :  { %v227_v7 = vld [vmem:[%s355_s1] sm:$0xff]  ;;  %v107_v16 = vld [vmem:[%s357_s3 + $0x8] sm:$0xff]  ;;  %s176_s15 = sshll.u32 %s275_s14, 4  ;;  %s277_s19 = smov 8   ;;  %s177_s15 = int_to_ptr.vmem [resolvable:$true] %s176_s15 }
   0x6   :  { %93 = vmatpush.bf16.msra.mxu0 %v233_v1  ;;  %v226_v8 = vld [vmem:[%s354_s0] sm:$0xff] }
   0x7   :  { %v239_v9 = vld [vmem:[%s356_s2] ss:$0 sm:$0xff]  ;;  %v240_v51 = vld [vmem:[%s356_s2 + $0x1] ss:$0 sm:$0xff]  ;;  %v241_v55 = vld [vmem:[%s356_s2 + $0x2] ss:$0 sm:$0xff] }
   0x8   :  { %v106_v11 = vld [vmem:[%s357_s3] sm:$0xff]  ;;  %s276_s2 = smov 128  }
   0xa   :  { %94 = vmatpush.bf16.msra.mxu0 %v232_v2  ;;  %v243_v21 = vpop.eup %242 }
   0xb   :  { %v118_v22 = vmul.f32 32.0, %v243_v21  ;;  %vm122_vm1 = vweird.f32 %v243_v21 }
   0xd   :  { %v119_v23 = vsub.f32 1.0, %v118_v22 }
   0xe   :  { %95 = vmatpush.bf16.msra.mxu0 %v231_v3 }
   0xf   :  { %v120_v24 = vmul.f32 %v243_v21, %v119_v23 }
  0x11   :  { %v121_v25 = vadd.f32 %v243_v21, %v120_v24 }
  0x12   :  { %96 = vmatpush.bf16.msra.mxu0 %v230_v4 }
  0x13   :  { %v123_v26 = vsel %vm122_vm1, %v243_v21, %v121_v25 }
  0x16   :  { %97 = vmatpush.bf16.msra.mxu0 %v229_v5 }
  0x1a   :  { %98 = vmatpush.bf16.msra.mxu0 %v228_v6 }
  0x1e   :  { %99 = vmatpush.bf16.msra.mxu0 %v227_v7 }
  0x21   :  { %100 = vmatmul.bf16.vlgmr.msra.gmra.mxu0 %v226_v8 }
  0x9e   :  { %v101_v10 = vpop.f32.mrf.mxu0 }
  0x9f   :  { %v102_v12 = vadd.f32 %v239_v9, %v101_v10 }
  0xa1   :  { %v108_v13 = vadd.f32 %v106_v11, %v102_v12 }
  0xa3   :  { %v111_v14 = vsel %vm110_vm0, %v108_v13, 0.0 }
  0xa4   :  { %112 = vadd.xlane.f32.xlu0 %v111_v14 }
  0xa6   :  { %v103_v15 = vpop.f32.mrf.mxu0 }
  0xa7   :  { %v104_v17 = vadd.f32 %v239_v9, %v103_v15 }
  0xa9   :  { %v109_v18 = vadd.f32 %v107_v16, %v104_v17 }
  0xab   :  { %v114_v19 = vsel %vm110_vm0, %v109_v18, 0.0 }
  0xac   :  { %115 = vadd.xlane.f32.xlu0 %v114_v19 }
 0x117   :  { %v113_v27 = vpop.xlane.xlu0 %112 }
 0x118   :  { %v124_v28 = vmul.f32 %v123_v26, %v113_v27 }
 0x11a   :  { %v126_v29 = vsub.f32 %v108_v13, %v124_v28 }
 0x11c   :  { %v128_v30 = vmul.f32 %v126_v29, %v126_v29 }
 0x11e   :  { %v130_v31 = vsel %vm110_vm0, %v128_v30, 0.0 }
 0x11f   :  { %131 = vadd.xlane.f32.xlu1 %v130_v31  ;;  %v116_v32 = vpop.xlane.xlu0 %115 }
 0x120   :  { %v125_v33 = vmul.f32 %v123_v26, %v116_v32 }
 0x122   :  { %v127_v34 = vsub.f32 %v109_v18, %v125_v33 }
 0x124   :  { %v129_v35 = vmul.f32 %v127_v34, %v127_v34 }
 0x126   :  { %v133_v36 = vsel %vm110_vm0, %v129_v35, 0.0 }
 0x127   :  { %134 = vadd.xlane.f32.xlu1 %v133_v36 }
 0x192   :  { %v132_v37 = vpop.xlane.xlu1 %131 }
 0x193   :  { %v136_v38 = vmul.f32 %v132_v37, %v123_v26 }
 0x195   :  { %v138_v39 = vadd.f32 1e-05, %v136_v38 }
 0x197   :  { %244 = vrsqrt.f32 %v138_v39  ;;  %vm146_vm3 = vweird.f32 %v138_v39 }
 0x19a   :  { %v135_v40 = vpop.xlane.xlu1 %134 }
 0x19b   :  { %v137_v41 = vmul.f32 %v135_v40, %v123_v26 }
 0x19d   :  { %v245_v42 = vpop.eup %244  ;;  %v139_v43 = vadd.f32 1e-05, %v137_v41 }
 0x19e   :  { %v141_v44 = vmul.f32 %v245_v42, %v138_v39  ;;  %vm147_vm2 = vweird.f32 %v245_v42 }
 0x19f   :  { %246 = vrsqrt.f32 %v139_v43  ;;  %vm148_vm4 = vmor %vm146_vm3, %vm147_vm2  ;;  %vm156_vm6 = vweird.f32 %v139_v43 }
 0x1a0   :  { %v142_v45 = vmul.f32 %v245_v42, %v141_v44 }
 0x1a2   :  { %v143_v46 = vmul.f32 0.5, %v142_v45 }
 0x1a4   :  { %v144_v47 = vsub.f32 1.5, %v143_v46 }
 0x1a5   :  { %v247_v48 = vpop.eup %246 }
 0x1a6   :  { %v145_v49 = vmul.f32 %v245_v42, %v144_v47  ;;  %v151_v50 = vmul.f32 %v247_v48, %v139_v43  ;;  %vm157_vm5 = vweird.f32 %v247_v48 }
 0x1a7   :  { %vm158_vm7 = vmor %vm156_vm6, %vm157_vm5 }
 0x1a8   :  { %v149_v52 = vsel %vm148_vm4, %v245_v42, %v145_v49  ;;  %v152_v53 = vmul.f32 %v247_v48, %v151_v50 }
 0x1a9   :  { %v160_v54 = vmul.f32 %v149_v52, %v126_v29 }
 0x1aa   :  { %v153_v56 = vmul.f32 0.5, %v152_v53 }
 0x1ab   :  { %v164_v57 = vmul.f32 %v240_v51, %v160_v54 }
 0x1ac   :  { %v154_v58 = vsub.f32 1.5, %v153_v56 }
 0x1ad   :  { %v168_v59 = vadd.f32 %v241_v55, %v164_v57 }
 0x1ae   :  { %v155_v60 = vmul.f32 %v247_v48, %v154_v58 }
 0x1af   :  { %170 = vst.msk [vmem:[#allocation2] sm:$0xff] %vm110_vm0, %v168_v59 }
 0x1b0   :  { %v159_v61 = vsel %vm158_vm7, %v247_v48, %v155_v60 }
 0x1b1   :  { %v161_v62 = vmul.f32 %v159_v61, %v127_v34 }
 0x1b3   :  { %v165_v63 = vmul.f32 %v240_v51, %v161_v62 }
 0x1b5   :  { %v169_v0 = vadd.f32 %v241_v55, %v165_v63 }
 0x1b7   :  { %171 = vst.msk [vmem:[#allocation2 + $0x8] sm:$0xff] %vm110_vm0, %v169_v0 }
 0x1b8   :  { %184 = dma.vmem_to_hbm [thread:$0]  %s177_s15, 256, %s179_s18, [#allocation3], %s276_s2, %s276_s2, %s277_s19  }
 0x1b9   :  { %272 = dma.done.wait [#allocation3], 256  }
 0x1ba   :  { %273 = vsyncadd [#allocation3], 4294967040 }
 0x1bb   :  { %189 = vsyncpa [#allocation3], 1 }

</bundles_post_ra>
